<compile_context>
chip_gen: v5e
topology: v5e:2x2
jax: 0.10.0
libtpu: 0.0.40
codegen_flags: <defaults>
</compile_context>

<pallas_src>
import math

import jax
import jax.numpy as jnp
from jax import lax
from jax.experimental import pallas as pl
from jax.experimental.pallas import tpu as pltpu

SELU_ALPHA = 1.6732632423543772
SELU_SCALE = 1.0507009873554805
NORM_EPS = 1e-12  # F.normalize default eps


def _selu(x):
    # exp() goes to the EUP slot; select/mul stay on the VPU.
    return SELU_SCALE * jnp.where(x > 0, x, SELU_ALPHA * (jnp.exp(x) - 1.0))


def _spherical_rnn_kernel(
    x_ref,      # (T*B, D)   time-major rows: row t*B + b
    wih_ref,    # (D, 4H)
    whh_ref,    # (H, 4H)
    blstm_ref,  # (1, 4H)    b_ih + b_hh
    w1_ref,     # (H, M1)
    b1_ref,     # (1, M1)
    w2_ref,     # (M1, M2)
    b2_ref,     # (1, M2)
    w3_ref,     # (M2, E_pad)  zero-padded to a 128-lane multiple
    b3_ref,     # (1, E_pad)
    out_ref,    # (B, E_pad)
):
    B = out_ref.shape[0]
    TB, _ = x_ref.shape
    T = TB // B
    H = whh_ref.shape[0]
    G = 4 * H
    f32 = jnp.float32

    # ---- hoisted input projection: ONE MXU matmul for all timesteps --------------------------
    # (T*B, D) @ (D, 4H); the LSTM bias is folded in here so it also leaves the loop.
    xp = jnp.dot(x_ref[...], wih_ref[...], preferred_element_type=f32) + blstm_ref[...]
    xp = xp.reshape(T, B, G)        # leading-dim split only (B % 8 == 0): layout no-op

    # ---- hoisted loop invariants ---------------------------------------------------------------
    whh = whh_ref[...]              # recurrent weight read once, stays value/register resident
    # Constant lane mask that doubles the g-gate pre-activations, so a SINGLE sigmoid pass over
    # the whole (B, 4H) gate slab yields every gate: tanh(x) == 2*sigmoid(2x) - 1 on the g lanes.
    lane = lax.broadcasted_iota(jnp.int32, (1, G), 1)
    g_scale = jnp.where((lane >= 2 * H) & (lane < 3 * H), 2.0, 1.0).astype(f32)
    g_scale = jnp.broadcast_to(g_scale, (B, G))          # broadcast hoisted (JAX won't CSE it)

    # ---- LSTM recurrence (PyTorch gate order i, f, g, o), fully unrolled -----------------------
    # h / c are loop-carried vreg values: no VMEM round-trip on the serial dependence chain.
    h = jnp.zeros((B, H), f32)
    c = jnp.zeros((B, H), f32)
    for t in range(T):              # T static -> full unroll; xp[t] is a tile-aligned static read
        pre = xp[t] + jnp.dot(h, whh, preferred_element_type=f32)   # (B, 4H): 1 MXU push / step
        sig = jax.nn.sigmoid(pre * g_scale)                         # 1 full-gate EUP pass / step
        i_g = sig[:, 0 * H:1 * H]
        f_g = sig[:, 1 * H:2 * H]
        g_g = 2.0 * sig[:, 2 * H:3 * H] - 1.0                       # == tanh(pre_g), VPU only
        o_g = sig[:, 3 * H:4 * H]
        c = f_g * c + i_g * g_g
        h = o_g * jnp.tanh(c)

    # ---- MLP head on the final hidden state -----------------------------------------------------
    a1 = _selu(jnp.dot(h, w1_ref[...], preferred_element_type=f32) + b1_ref[...])
    a2 = _selu(jnp.dot(a1, w2_ref[...], preferred_element_type=f32) + b2_ref[...])
    z = jnp.dot(a2, w3_ref[...], preferred_element_type=f32) + b3_ref[...]   # (B, E_pad)

    # ---- project to the sphere: z / max(||z||_2, eps) via rsqrt (EUP slot) ----------------------
    # Padded columns of w3 / b3 are zero, so they contribute nothing to the norm.
    sum_sq = jnp.sum(z * z, axis=1, keepdims=True)
    inv_norm = lax.rsqrt(jnp.maximum(sum_sq, NORM_EPS * NORM_EPS))
    out_ref[...] = z * inv_norm     # lane-dense (B, 128k) store (unmasked vst)


def spherical_rnn_forward(x, params):
    """x: (B, T, input_size) float32, batch_first like the PyTorch module."""
    B, T, D = x.shape
    H = params["whh"].shape[0]
    E = params["w3"].shape[1]

    # Pad batch to the f32 sublane multiple (8) and the embedding dim to a full 128-lane multiple
    # (lane-dense output store); both pads are sliced off below.
    B_pad = max(8, -(-B // 8) * 8)
    E_pad = max(128, -(-E // 128) * 128)

    if B_pad != B:
        x = jnp.pad(x, ((0, B_pad - B), (0, 0), (0, 0)))

    # Time-major 2D view: the hoisted projection's per-step slabs then become contiguous,
    # tile-aligned slices inside the kernel.  Disappears with the grid=(T,) streaming TODO.
    x_tm = jnp.transpose(x, (1, 0, 2)).reshape(T * B_pad, D)

    w3_pad = jnp.pad(params["w3"], ((0, 0), (0, E_pad - E)))
    b3_pad = jnp.pad(params["b3"], ((0, 0), (0, E_pad - E)))

    args = (
        x_tm, params["wih"], params["whh"], params["blstm"],
        params["w1"], params["b1"],
        params["w2"], params["b2"],
        w3_pad, b3_pad,
    )

    # Size the VMEM limit from the actual working set (inputs + output + the hoisted (T*B, 4H)
    # projection) with generous headroom — not a blanket 32 MiB (v7x only has 64 MiB of VMEM).
    working_set = sum(int(a.size) * a.dtype.itemsize for a in args)
    working_set += B_pad * E_pad * 4            # output
    working_set += T * B_pad * 4 * H * 4        # hoisted input projection
    vmem_limit = int(max(4 * 1024 * 1024, 2 * working_set))

    vmem = pl.BlockSpec(memory_space=pltpu.MemorySpace.VMEM)
    out = pl.pallas_call(
        _spherical_rnn_kernel,
        out_shape=jax.ShapeDtypeStruct((B_pad, E_pad), jnp.float32),
        in_specs=[vmem] * len(args),
        out_specs=vmem,
        compiler_params=pltpu.CompilerParams(vmem_limit_bytes=vmem_limit),
    )(*args)
    return out[:B, :E]


def init_params(key, input_size, hidden_size, embedding_dim, mlp_hidden_dims=(64, 32)):
    """Deterministic synthetic init matching the module's _init_weights scheme."""
    ks = jax.random.split(key, 8)
    H = hidden_size

    # LSTM: weight_ih ~ N(0, 1/sqrt(input_size)), weight_hh orthogonal, biases zero.
    w_ih = jax.random.normal(ks[0], (4 * H, input_size), jnp.float32) / math.sqrt(input_size)
    w_hh = jax.nn.initializers.orthogonal()(ks[1], (4 * H, H), jnp.float32)
    b_lstm = jnp.zeros((1, 4 * H), jnp.float32)  # b_ih + b_hh (both zero)

    def linear(k, fan_in, fan_out):
        w = jax.random.normal(k, (fan_in, fan_out), jnp.float32) / math.sqrt(fan_in)
        b = jnp.zeros((1, fan_out), jnp.float32)
        return w, b

    m1, m2 = mlp_hidden_dims
    w1, b1 = linear(ks[2], H, m1)
    w2, b2 = linear(ks[3], m1, m2)
    w3, b3 = linear(ks[4], m2, embedding_dim)

    return {
        "wih": w_ih.T,      # (D, 4H)   right-multiply form, gate order [i|f|g|o]
        "whh": w_hh.T,      # (H, 4H)
        "blstm": b_lstm,    # (1, 4H)
        "w1": w1, "b1": b1,
        "w2": w2, "b2": b2,
        "w3": w3, "b3": b3,
    }


def _reference_forward(x, params):
    """Plain-JAX LSTM -> MLP -> L2-normalize (direct transcription of the PyTorch forward)."""
    B, T, _ = x.shape
    H = params["whh"].shape[0]
    h = jnp.zeros((B, H), jnp.float32)
    c = jnp.zeros((B, H), jnp.float32)
    for t in range(T):
        g = x[:, t, :] @ params["wih"] + h @ params["whh"] + params["blstm"]
        i = jax.nn.sigmoid(g[:, 0 * H:1 * H])
        f = jax.nn.sigmoid(g[:, 1 * H:2 * H])
        gg = jnp.tanh(g[:, 2 * H:3 * H])
        o = jax.nn.sigmoid(g[:, 3 * H:4 * H])
        c = f * c + i * gg
        h = o * jnp.tanh(c)
    a1 = jax.nn.selu(h @ params["w1"] + params["b1"])
    a2 = jax.nn.selu(a1 @ params["w2"] + params["b2"])
    z = a2 @ params["w3"] + params["b3"]
    norm = jnp.sqrt(jnp.sum(z * z, axis=1, keepdims=True))
    return z / jnp.maximum(norm, NORM_EPS)


if __name__ == "__main__":
    B, T = 8, 8
    input_size, hidden_size, embedding_dim = 16, 32, 8

    key = jax.random.PRNGKey(0)
    kx, kp = jax.random.split(key)
    x = jax.random.normal(kx, (B, T, input_size), jnp.float32)
    params = init_params(kp, input_size, hidden_size, embedding_dim)

    z_sphere = spherical_rnn_forward(x, params)
    jax.block_until_ready(z_sphere)

    assert z_sphere.shape == (B, embedding_dim)

    # rows must be (near) unit-norm
    norms = jnp.sqrt(jnp.sum(z_sphere * z_sphere, axis=1))
    assert bool(jnp.all(jnp.abs(norms - 1.0) < 1e-3)), norms

    # end-to-end numerical check against a plain JAX transcription of the PyTorch forward
    z_ref = _reference_forward(x, params)
    max_err = float(jnp.max(jnp.abs(z_sphere - z_ref)))
    assert max_err < 5e-2, f"kernel deviates from reference: max abs err {max_err}"

    print("KERNEL_OK")
</pallas_src>

<mosaic_0001>
module attributes {stable_mosaic.version = 11 : i64} {
  func.func @_spherical_rnn_kernel(%arg0: memref<64x16xf32, #tpu.memory_space<vmem>>, %arg1: memref<16x128xf32, #tpu.memory_space<vmem>>, %arg2: memref<32x128xf32, #tpu.memory_space<vmem>>, %arg3: memref<1x128xf32, #tpu.memory_space<vmem>>, %arg4: memref<32x64xf32, #tpu.memory_space<vmem>>, %arg5: memref<1x64xf32, #tpu.memory_space<vmem>>, %arg6: memref<64x32xf32, #tpu.memory_space<vmem>>, %arg7: memref<1x32xf32, #tpu.memory_space<vmem>>, %arg8: memref<32x128xf32, #tpu.memory_space<vmem>>, %arg9: memref<1x128xf32, #tpu.memory_space<vmem>>, %arg10: memref<8x128xf32, #tpu.memory_space<vmem>>) attributes {dimension_semantics = [], scalar_prefetch = 0 : i64, scratch_operands = 0 : i64, tpu.core_type = #tpu.core_type<tc>} {
    %c0 = arith.constant 0 : index
    %c0_0 = arith.constant 0 : index
    %0 = vector.load %arg0[%c0, %c0_0] : memref<64x16xf32, #tpu.memory_space<vmem>>, vector<64x16xf32>
    %c0_1 = arith.constant 0 : index
    %c0_2 = arith.constant 0 : index
    %1 = vector.load %arg1[%c0_1, %c0_2] : memref<16x128xf32, #tpu.memory_space<vmem>>, vector<16x128xf32>
    %cst = arith.constant dense<0.000000e+00> : vector<64x128xf32>
    %2 = tpu.matmul %0, %1, %cst {dimension_numbers = #tpu.dot_dimension_numbers<[1], [0], [0], [1], [0, 0, 1, 1], [], []>} : vector<64x16xf32>, vector<16x128xf32>, vector<64x128xf32> -> vector<64x128xf32>
    %c0_3 = arith.constant 0 : index
    %c0_4 = arith.constant 0 : index
    %3 = vector.load %arg3[%c0_3, %c0_4] : memref<1x128xf32, #tpu.memory_space<vmem>>, vector<1x128xf32>
    %4 = vector.broadcast %3 : vector<1x128xf32> to vector<64x128xf32>
    %5 = arith.addf %2, %4 : vector<64x128xf32>
    %6 = vector.shape_cast %5 : vector<64x128xf32> to vector<8x8x128xf32>
    %c0_5 = arith.constant 0 : index
    %c0_6 = arith.constant 0 : index
    %7 = vector.load %arg2[%c0_5, %c0_6] : memref<32x128xf32, #tpu.memory_space<vmem>>, vector<32x128xf32>
    %8 = tpu.iota {dimensions = array<i32: 1>} : vector<1x128xi32>
    %c64_i32 = arith.constant 64 : i32
    %9 = vector.broadcast %c64_i32 : i32 to vector<1x128xi32>
    %10 = arith.cmpi sge, %8, %9 : vector<1x128xi32>
    %c96_i32 = arith.constant 96 : i32
    %11 = vector.broadcast %c96_i32 : i32 to vector<1x128xi32>
    %12 = arith.cmpi slt, %8, %11 : vector<1x128xi32>
    %13 = arith.andi %10, %12 : vector<1x128xi1>
    %cst_7 = arith.constant 2.000000e+00 : f32
    %cst_8 = arith.constant 1.000000e+00 : f32
    %14 = vector.broadcast %cst_7 : f32 to vector<1x128xf32>
    %15 = vector.broadcast %cst_8 : f32 to vector<1x128xf32>
    %16 = arith.select %13, %14, %15 : vector<1x128xi1>, vector<1x128xf32>
    %17 = vector.shape_cast %16 : vector<1x128xf32> to vector<1x128xf32>
    %18 = vector.broadcast %17 : vector<1x128xf32> to vector<8x128xf32>
    %cst_9 = arith.constant 0.000000e+00 : f32
    %19 = vector.broadcast %cst_9 : f32 to vector<8x32xf32>
    %cst_10 = arith.constant 0.000000e+00 : f32
    %20 = vector.broadcast %cst_10 : f32 to vector<8x32xf32>
    %21 = vector.extract_strided_slice %6 {offsets = [0, 0, 0], sizes = [1, 8, 128], strides = [1, 1, 1]} : vector<8x8x128xf32> to vector<1x8x128xf32>
    %22 = vector.shape_cast %21 : vector<1x8x128xf32> to vector<8x128xf32>
    %cst_11 = arith.constant dense<0.000000e+00> : vector<8x128xf32>
    %23 = tpu.matmul %19, %7, %cst_11 {dimension_numbers = #tpu.dot_dimension_numbers<[1], [0], [0], [1], [0, 0, 1, 1], [], []>} : vector<8x32xf32>, vector<32x128xf32>, vector<8x128xf32> -> vector<8x128xf32>
    %24 = arith.addf %22, %23 : vector<8x128xf32>
    %25 = arith.mulf %24, %18 : vector<8x128xf32>
    %26 = arith.negf %25 : vector<8x128xf32>
    %27 = math.exp %26 : vector<8x128xf32>
    %cst_12 = arith.constant 1.000000e+00 : f32
    %28 = vector.broadcast %cst_12 : f32 to vector<8x128xf32>
    %29 = arith.addf %28, %27 : vector<8x128xf32>
    %30 = arith.divf %28, %29 : vector<8x128xf32>
    %31 = vector.extract_strided_slice %30 {offsets = [0, 0], sizes = [8, 32], strides = [1, 1]} : vector<8x128xf32> to vector<8x32xf32>
    %32 = vector.extract_strided_slice %30 {offsets = [0, 32], sizes = [8, 32], strides = [1, 1]} : vector<8x128xf32> to vector<8x32xf32>
    %33 = vector.extract_strided_slice %30 {offsets = [0, 64], sizes = [8, 32], strides = [1, 1]} : vector<8x128xf32> to vector<8x32xf32>
    %cst_13 = arith.constant 2.000000e+00 : f32
    %34 = vector.broadcast %cst_13 : f32 to vector<8x32xf32>
    %35 = arith.mulf %34, %33 : vector<8x32xf32>
    %cst_14 = arith.constant 1.000000e+00 : f32
    %36 = vector.broadcast %cst_14 : f32 to vector<8x32xf32>
    %37 = arith.subf %35, %36 : vector<8x32xf32>
    %38 = vector.extract_strided_slice %30 {offsets = [0, 96], sizes = [8, 32], strides = [1, 1]} : vector<8x128xf32> to vector<8x32xf32>
    %39 = arith.mulf %32, %20 : vector<8x32xf32>
    %40 = arith.mulf %31, %37 : vector<8x32xf32>
    %41 = arith.addf %39, %40 : vector<8x32xf32>
    %42 = math.tanh %41 : vector<8x32xf32>
    %43 = arith.mulf %38, %42 : vector<8x32xf32>
    %44 = vector.extract_strided_slice %6 {offsets = [1, 0, 0], sizes = [1, 8, 128], strides = [1, 1, 1]} : vector<8x8x128xf32> to vector<1x8x128xf32>
    %45 = vector.shape_cast %44 : vector<1x8x128xf32> to vector<8x128xf32>
    %cst_15 = arith.constant dense<0.000000e+00> : vector<8x128xf32>
    %46 = tpu.matmul %43, %7, %cst_15 {dimension_numbers = #tpu.dot_dimension_numbers<[1], [0], [0], [1], [0, 0, 1, 1], [], []>} : vector<8x32xf32>, vector<32x128xf32>, vector<8x128xf32> -> vector<8x128xf32>
    %47 = arith.addf %45, %46 : vector<8x128xf32>
    %48 = arith.mulf %47, %18 : vector<8x128xf32>
    %49 = arith.negf %48 : vector<8x128xf32>
    %50 = math.exp %49 : vector<8x128xf32>
    %cst_16 = arith.constant 1.000000e+00 : f32
    %51 = vector.broadcast %cst_16 : f32 to vector<8x128xf32>
    %52 = arith.addf %51, %50 : vector<8x128xf32>
    %53 = arith.divf %51, %52 : vector<8x128xf32>
    %54 = vector.extract_strided_slice %53 {offsets = [0, 0], sizes = [8, 32], strides = [1, 1]} : vector<8x128xf32> to vector<8x32xf32>
    %55 = vector.extract_strided_slice %53 {offsets = [0, 32], sizes = [8, 32], strides = [1, 1]} : vector<8x128xf32> to vector<8x32xf32>
    %56 = vector.extract_strided_slice %53 {offsets = [0, 64], sizes = [8, 32], strides = [1, 1]} : vector<8x128xf32> to vector<8x32xf32>
    %cst_17 = arith.constant 2.000000e+00 : f32
    %57 = vector.broadcast %cst_17 : f32 to vector<8x32xf32>
    %58 = arith.mulf %57, %56 : vector<8x32xf32>
    %cst_18 = arith.constant 1.000000e+00 : f32
    %59 = vector.broadcast %cst_18 : f32 to vector<8x32xf32>
    %60 = arith.subf %58, %59 : vector<8x32xf32>
    %61 = vector.extract_strided_slice %53 {offsets = [0, 96], sizes = [8, 32], strides = [1, 1]} : vector<8x128xf32> to vector<8x32xf32>
    %62 = arith.mulf %55, %41 : vector<8x32xf32>
    %63 = arith.mulf %54, %60 : vector<8x32xf32>
    %64 = arith.addf %62, %63 : vector<8x32xf32>
    %65 = math.tanh %64 : vector<8x32xf32>
    %66 = arith.mulf %61, %65 : vector<8x32xf32>
    %67 = vector.extract_strided_slice %6 {offsets = [2, 0, 0], sizes = [1, 8, 128], strides = [1, 1, 1]} : vector<8x8x128xf32> to vector<1x8x128xf32>
    %68 = vector.shape_cast %67 : vector<1x8x128xf32> to vector<8x128xf32>
    %cst_19 = arith.constant dense<0.000000e+00> : vector<8x128xf32>
    %69 = tpu.matmul %66, %7, %cst_19 {dimension_numbers = #tpu.dot_dimension_numbers<[1], [0], [0], [1], [0, 0, 1, 1], [], []>} : vector<8x32xf32>, vector<32x128xf32>, vector<8x128xf32> -> vector<8x128xf32>
    %70 = arith.addf %68, %69 : vector<8x128xf32>
    %71 = arith.mulf %70, %18 : vector<8x128xf32>
    %72 = arith.negf %71 : vector<8x128xf32>
    %73 = math.exp %72 : vector<8x128xf32>
    %cst_20 = arith.constant 1.000000e+00 : f32
    %74 = vector.broadcast %cst_20 : f32 to vector<8x128xf32>
    %75 = arith.addf %74, %73 : vector<8x128xf32>
    %76 = arith.divf %74, %75 : vector<8x128xf32>
    %77 = vector.extract_strided_slice %76 {offsets = [0, 0], sizes = [8, 32], strides = [1, 1]} : vector<8x128xf32> to vector<8x32xf32>
    %78 = vector.extract_strided_slice %76 {offsets = [0, 32], sizes = [8, 32], strides = [1, 1]} : vector<8x128xf32> to vector<8x32xf32>
    %79 = vector.extract_strided_slice %76 {offsets = [0, 64], sizes = [8, 32], strides = [1, 1]} : vector<8x128xf32> to vector<8x32xf32>
    %cst_21 = arith.constant 2.000000e+00 : f32
    %80 = vector.broadcast %cst_21 : f32 to vector<8x32xf32>
    %81 = arith.mulf %80, %79 : vector<8x32xf32>
    %cst_22 = arith.constant 1.000000e+00 : f32
    %82 = vector.broadcast %cst_22 : f32 to vector<8x32xf32>
    %83 = arith.subf %81, %82 : vector<8x32xf32>
    %84 = vector.extract_strided_slice %76 {offsets = [0, 96], sizes = [8, 32], strides = [1, 1]} : vector<8x128xf32> to vector<8x32xf32>
    %85 = arith.mulf %78, %64 : vector<8x32xf32>
    %86 = arith.mulf %77, %83 : vector<8x32xf32>
    %87 = arith.addf %85, %86 : vector<8x32xf32>
    %88 = math.tanh %87 : vector<8x32xf32>
    %89 = arith.mulf %84, %88 : vector<8x32xf32>
    %90 = vector.extract_strided_slice %6 {offsets = [3, 0, 0], sizes = [1, 8, 128], strides = [1, 1, 1]} : vector<8x8x128xf32> to vector<1x8x128xf32>
    %91 = vector.shape_cast %90 : vector<1x8x128xf32> to vector<8x128xf32>
    %cst_23 = arith.constant dense<0.000000e+00> : vector<8x128xf32>
    %92 = tpu.matmul %89, %7, %cst_23 {dimension_numbers = #tpu.dot_dimension_numbers<[1], [0], [0], [1], [0, 0, 1, 1], [], []>} : vector<8x32xf32>, vector<32x128xf32>, vector<8x128xf32> -> vector<8x128xf32>
    %93 = arith.addf %91, %92 : vector<8x128xf32>
    %94 = arith.mulf %93, %18 : vector<8x128xf32>
    %95 = arith.negf %94 : vector<8x128xf32>
    %96 = math.exp %95 : vector<8x128xf32>
    %cst_24 = arith.constant 1.000000e+00 : f32
    %97 = vector.broadcast %cst_24 : f32 to vector<8x128xf32>
    %98 = arith.addf %97, %96 : vector<8x128xf32>
    %99 = arith.divf %97, %98 : vector<8x128xf32>
    %100 = vector.extract_strided_slice %99 {offsets = [0, 0], sizes = [8, 32], strides = [1, 1]} : vector<8x128xf32> to vector<8x32xf32>
    %101 = vector.extract_strided_slice %99 {offsets = [0, 32], sizes = [8, 32], strides = [1, 1]} : vector<8x128xf32> to vector<8x32xf32>
    %102 = vector.extract_strided_slice %99 {offsets = [0, 64], sizes = [8, 32], strides = [1, 1]} : vector<8x128xf32> to vector<8x32xf32>
    %cst_25 = arith.constant 2.000000e+00 : f32
    %103 = vector.broadcast %cst_25 : f32 to vector<8x32xf32>
    %104 = arith.mulf %103, %102 : vector<8x32xf32>
    %cst_26 = arith.constant 1.000000e+00 : f32
    %105 = vector.broadcast %cst_26 : f32 to vector<8x32xf32>
    %106 = arith.subf %104, %105 : vector<8x32xf32>
    %107 = vector.extract_strided_slice %99 {offsets = [0, 96], sizes = [8, 32], strides = [1, 1]} : vector<8x128xf32> to vector<8x32xf32>
    %108 = arith.mulf %101, %87 : vector<8x32xf32>
    %109 = arith.mulf %100, %106 : vector<8x32xf32>
    %110 = arith.addf %108, %109 : vector<8x32xf32>
    %111 = math.tanh %110 : vector<8x32xf32>
    %112 = arith.mulf %107, %111 : vector<8x32xf32>
    %113 = vector.extract_strided_slice %6 {offsets = [4, 0, 0], sizes = [1, 8, 128], strides = [1, 1, 1]} : vector<8x8x128xf32> to vector<1x8x128xf32>
    %114 = vector.shape_cast %113 : vector<1x8x128xf32> to vector<8x128xf32>
    %cst_27 = arith.constant dense<0.000000e+00> : vector<8x128xf32>
    %115 = tpu.matmul %112, %7, %cst_27 {dimension_numbers = #tpu.dot_dimension_numbers<[1], [0], [0], [1], [0, 0, 1, 1], [], []>} : vector<8x32xf32>, vector<32x128xf32>, vector<8x128xf32> -> vector<8x128xf32>
    %116 = arith.addf %114, %115 : vector<8x128xf32>
    %117 = arith.mulf %116, %18 : vector<8x128xf32>
    %118 = arith.negf %117 : vector<8x128xf32>
    %119 = math.exp %118 : vector<8x128xf32>
    %cst_28 = arith.constant 1.000000e+00 : f32
    %120 = vector.broadcast %cst_28 : f32 to vector<8x128xf32>
    %121 = arith.addf %120, %119 : vector<8x128xf32>
    %122 = arith.divf %120, %121 : vector<8x128xf32>
    %123 = vector.extract_strided_slice %122 {offsets = [0, 0], sizes = [8, 32], strides = [1, 1]} : vector<8x128xf32> to vector<8x32xf32>
    %124 = vector.extract_strided_slice %122 {offsets = [0, 32], sizes = [8, 32], strides = [1, 1]} : vector<8x128xf32> to vector<8x32xf32>
    %125 = vector.extract_strided_slice %122 {offsets = [0, 64], sizes = [8, 32], strides = [1, 1]} : vector<8x128xf32> to vector<8x32xf32>
    %cst_29 = arith.constant 2.000000e+00 : f32
    %126 = vector.broadcast %cst_29 : f32 to vector<8x32xf32>
    %127 = arith.mulf %126, %125 : vector<8x32xf32>
    %cst_30 = arith.constant 1.000000e+00 : f32
    %128 = vector.broadcast %cst_30 : f32 to vector<8x32xf32>
    %129 = arith.subf %127, %128 : vector<8x32xf32>
    %130 = vector.extract_strided_slice %122 {offsets = [0, 96], sizes = [8, 32], strides = [1, 1]} : vector<8x128xf32> to vector<8x32xf32>
    %131 = arith.mulf %124, %110 : vector<8x32xf32>
    %132 = arith.mulf %123, %129 : vector<8x32xf32>
    %133 = arith.addf %131, %132 : vector<8x32xf32>
    %134 = math.tanh %133 : vector<8x32xf32>
    %135 = arith.mulf %130, %134 : vector<8x32xf32>
    %136 = vector.extract_strided_slice %6 {offsets = [5, 0, 0], sizes = [1, 8, 128], strides = [1, 1, 1]} : vector<8x8x128xf32> to vector<1x8x128xf32>
    %137 = vector.shape_cast %136 : vector<1x8x128xf32> to vector<8x128xf32>
    %cst_31 = arith.constant dense<0.000000e+00> : vector<8x128xf32>
    %138 = tpu.matmul %135, %7, %cst_31 {dimension_numbers = #tpu.dot_dimension_numbers<[1], [0], [0], [1], [0, 0, 1, 1], [], []>} : vector<8x32xf32>, vector<32x128xf32>, vector<8x128xf32> -> vector<8x128xf32>
    %139 = arith.addf %137, %138 : vector<8x128xf32>
    %140 = arith.mulf %139, %18 : vector<8x128xf32>
    %141 = arith.negf %140 : vector<8x128xf32>
    %142 = math.exp %141 : vector<8x128xf32>
    %cst_32 = arith.constant 1.000000e+00 : f32
    %143 = vector.broadcast %cst_32 : f32 to vector<8x128xf32>
    %144 = arith.addf %143, %142 : vector<8x128xf32>
    %145 = arith.divf %143, %144 : vector<8x128xf32>
    %146 = vector.extract_strided_slice %145 {offsets = [0, 0], sizes = [8, 32], strides = [1, 1]} : vector<8x128xf32> to vector<8x32xf32>
    %147 = vector.extract_strided_slice %145 {offsets = [0, 32], sizes = [8, 32], strides = [1, 1]} : vector<8x128xf32> to vector<8x32xf32>
    %148 = vector.extract_strided_slice %145 {offsets = [0, 64], sizes = [8, 32], strides = [1, 1]} : vector<8x128xf32> to vector<8x32xf32>
    %cst_33 = arith.constant 2.000000e+00 : f32
    %149 = vector.broadcast %cst_33 : f32 to vector<8x32xf32>
    %150 = arith.mulf %149, %148 : vector<8x32xf32>
    %cst_34 = arith.constant 1.000000e+00 : f32
    %151 = vector.broadcast %cst_34 : f32 to vector<8x32xf32>
    %152 = arith.subf %150, %151 : vector<8x32xf32>
    %153 = vector.extract_strided_slice %145 {offsets = [0, 96], sizes = [8, 32], strides = [1, 1]} : vector<8x128xf32> to vector<8x32xf32>
    %154 = arith.mulf %147, %133 : vector<8x32xf32>
    %155 = arith.mulf %146, %152 : vector<8x32xf32>
    %156 = arith.addf %154, %155 : vector<8x32xf32>
    %157 = math.tanh %156 : vector<8x32xf32>
    %158 = arith.mulf %153, %157 : vector<8x32xf32>
    %159 = vector.extract_strided_slice %6 {offsets = [6, 0, 0], sizes = [1, 8, 128], strides = [1, 1, 1]} : vector<8x8x128xf32> to vector<1x8x128xf32>
    %160 = vector.shape_cast %159 : vector<1x8x128xf32> to vector<8x128xf32>
    %cst_35 = arith.constant dense<0.000000e+00> : vector<8x128xf32>
    %161 = tpu.matmul %158, %7, %cst_35 {dimension_numbers = #tpu.dot_dimension_numbers<[1], [0], [0], [1], [0, 0, 1, 1], [], []>} : vector<8x32xf32>, vector<32x128xf32>, vector<8x128xf32> -> vector<8x128xf32>
    %162 = arith.addf %160, %161 : vector<8x128xf32>
    %163 = arith.mulf %162, %18 : vector<8x128xf32>
    %164 = arith.negf %163 : vector<8x128xf32>
    %165 = math.exp %164 : vector<8x128xf32>
    %cst_36 = arith.constant 1.000000e+00 : f32
    %166 = vector.broadcast %cst_36 : f32 to vector<8x128xf32>
    %167 = arith.addf %166, %165 : vector<8x128xf32>
    %168 = arith.divf %166, %167 : vector<8x128xf32>
    %169 = vector.extract_strided_slice %168 {offsets = [0, 0], sizes = [8, 32], strides = [1, 1]} : vector<8x128xf32> to vector<8x32xf32>
    %170 = vector.extract_strided_slice %168 {offsets = [0, 32], sizes = [8, 32], strides = [1, 1]} : vector<8x128xf32> to vector<8x32xf32>
    %171 = vector.extract_strided_slice %168 {offsets = [0, 64], sizes = [8, 32], strides = [1, 1]} : vector<8x128xf32> to vector<8x32xf32>
    %cst_37 = arith.constant 2.000000e+00 : f32
    %172 = vector.broadcast %cst_37 : f32 to vector<8x32xf32>
    %173 = arith.mulf %172, %171 : vector<8x32xf32>
    %cst_38 = arith.constant 1.000000e+00 : f32
    %174 = vector.broadcast %cst_38 : f32 to vector<8x32xf32>
    %175 = arith.subf %173, %174 : vector<8x32xf32>
    %176 = vector.extract_strided_slice %168 {offsets = [0, 96], sizes = [8, 32], strides = [1, 1]} : vector<8x128xf32> to vector<8x32xf32>
    %177 = arith.mulf %170, %156 : vector<8x32xf32>
    %178 = arith.mulf %169, %175 : vector<8x32xf32>
    %179 = arith.addf %177, %178 : vector<8x32xf32>
    %180 = math.tanh %179 : vector<8x32xf32>
    %181 = arith.mulf %176, %180 : vector<8x32xf32>
    %182 = vector.extract_strided_slice %6 {offsets = [7, 0, 0], sizes = [1, 8, 128], strides = [1, 1, 1]} : vector<8x8x128xf32> to vector<1x8x128xf32>
    %183 = vector.shape_cast %182 : vector<1x8x128xf32> to vector<8x128xf32>
    %cst_39 = arith.constant dense<0.000000e+00> : vector<8x128xf32>
    %184 = tpu.matmul %181, %7, %cst_39 {dimension_numbers = #tpu.dot_dimension_numbers<[1], [0], [0], [1], [0, 0, 1, 1], [], []>} : vector<8x32xf32>, vector<32x128xf32>, vector<8x128xf32> -> vector<8x128xf32>
    %185 = arith.addf %183, %184 : vector<8x128xf32>
    %186 = arith.mulf %185, %18 : vector<8x128xf32>
    %187 = arith.negf %186 : vector<8x128xf32>
    %188 = math.exp %187 : vector<8x128xf32>
    %cst_40 = arith.constant 1.000000e+00 : f32
    %189 = vector.broadcast %cst_40 : f32 to vector<8x128xf32>
    %190 = arith.addf %189, %188 : vector<8x128xf32>
    %191 = arith.divf %189, %190 : vector<8x128xf32>
    %192 = vector.extract_strided_slice %191 {offsets = [0, 0], sizes = [8, 32], strides = [1, 1]} : vector<8x128xf32> to vector<8x32xf32>
    %193 = vector.extract_strided_slice %191 {offsets = [0, 32], sizes = [8, 32], strides = [1, 1]} : vector<8x128xf32> to vector<8x32xf32>
    %194 = vector.extract_strided_slice %191 {offsets = [0, 64], sizes = [8, 32], strides = [1, 1]} : vector<8x128xf32> to vector<8x32xf32>
    %cst_41 = arith.constant 2.000000e+00 : f32
    %195 = vector.broadcast %cst_41 : f32 to vector<8x32xf32>
    %196 = arith.mulf %195, %194 : vector<8x32xf32>
    %cst_42 = arith.constant 1.000000e+00 : f32
    %197 = vector.broadcast %cst_42 : f32 to vector<8x32xf32>
    %198 = arith.subf %196, %197 : vector<8x32xf32>
    %199 = vector.extract_strided_slice %191 {offsets = [0, 96], sizes = [8, 32], strides = [1, 1]} : vector<8x128xf32> to vector<8x32xf32>
    %200 = arith.mulf %193, %179 : vector<8x32xf32>
    %201 = arith.mulf %192, %198 : vector<8x32xf32>
    %202 = arith.addf %200, %201 : vector<8x32xf32>
    %203 = math.tanh %202 : vector<8x32xf32>
    %204 = arith.mulf %199, %203 : vector<8x32xf32>
    %c0_43 = arith.constant 0 : index
    %c0_44 = arith.constant 0 : index
    %205 = vector.load %arg4[%c0_43, %c0_44] : memref<32x64xf32, #tpu.memory_space<vmem>>, vector<32x64xf32>
    %cst_45 = arith.constant dense<0.000000e+00> : vector<8x64xf32>
    %206 = tpu.matmul %204, %205, %cst_45 {dimension_numbers = #tpu.dot_dimension_numbers<[1], [0], [0], [1], [0, 0, 1, 1], [], []>} : vector<8x32xf32>, vector<32x64xf32>, vector<8x64xf32> -> vector<8x64xf32>
    %c0_46 = arith.constant 0 : index
    %c0_47 = arith.constant 0 : index
    %207 = vector.load %arg5[%c0_46, %c0_47] : memref<1x64xf32, #tpu.memory_space<vmem>>, vector<1x64xf32>
    %208 = vector.broadcast %207 : vector<1x64xf32> to vector<8x64xf32>
    %209 = arith.addf %206, %208 : vector<8x64xf32>
    %cst_48 = arith.constant 0.000000e+00 : f32
    %210 = vector.broadcast %cst_48 : f32 to vector<8x64xf32>
    %211 = arith.cmpf ogt, %209, %210 : vector<8x64xf32>
    %212 = math.exp %209 : vector<8x64xf32>
    %cst_49 = arith.constant 1.000000e+00 : f32
    %213 = vector.broadcast %cst_49 : f32 to vector<8x64xf32>
    %214 = arith.subf %212, %213 : vector<8x64xf32>
    %cst_50 = arith.constant 1.67326319 : f32
    %215 = vector.broadcast %cst_50 : f32 to vector<8x64xf32>
    %216 = arith.mulf %215, %214 : vector<8x64xf32>
    %217 = arith.select %211, %209, %216 : vector<8x64xi1>, vector<8x64xf32>
    %cst_51 = arith.constant 1.05070102 : f32
    %218 = vector.broadcast %cst_51 : f32 to vector<8x64xf32>
    %219 = arith.mulf %218, %217 : vector<8x64xf32>
    %c0_52 = arith.constant 0 : index
    %c0_53 = arith.constant 0 : index
    %220 = vector.load %arg6[%c0_52, %c0_53] : memref<64x32xf32, #tpu.memory_space<vmem>>, vector<64x32xf32>
    %cst_54 = arith.constant dense<0.000000e+00> : vector<8x32xf32>
    %221 = tpu.matmul %219, %220, %cst_54 {dimension_numbers = #tpu.dot_dimension_numbers<[1], [0], [0], [1], [0, 0, 1, 1], [], []>} : vector<8x64xf32>, vector<64x32xf32>, vector<8x32xf32> -> vector<8x32xf32>
    %c0_55 = arith.constant 0 : index
    %c0_56 = arith.constant 0 : index
    %222 = vector.load %arg7[%c0_55, %c0_56] : memref<1x32xf32, #tpu.memory_space<vmem>>, vector<1x32xf32>
    %223 = vector.broadcast %222 : vector<1x32xf32> to vector<8x32xf32>
    %224 = arith.addf %221, %223 : vector<8x32xf32>
    %cst_57 = arith.constant 0.000000e+00 : f32
    %225 = vector.broadcast %cst_57 : f32 to vector<8x32xf32>
    %226 = arith.cmpf ogt, %224, %225 : vector<8x32xf32>
    %227 = math.exp %224 : vector<8x32xf32>
    %cst_58 = arith.constant 1.000000e+00 : f32
    %228 = vector.broadcast %cst_58 : f32 to vector<8x32xf32>
    %229 = arith.subf %227, %228 : vector<8x32xf32>
    %cst_59 = arith.constant 1.67326319 : f32
    %230 = vector.broadcast %cst_59 : f32 to vector<8x32xf32>
    %231 = arith.mulf %230, %229 : vector<8x32xf32>
    %232 = arith.select %226, %224, %231 : vector<8x32xi1>, vector<8x32xf32>
    %cst_60 = arith.constant 1.05070102 : f32
    %233 = vector.broadcast %cst_60 : f32 to vector<8x32xf32>
    %234 = arith.mulf %233, %232 : vector<8x32xf32>
    %c0_61 = arith.constant 0 : index
    %c0_62 = arith.constant 0 : index
    %235 = vector.load %arg8[%c0_61, %c0_62] : memref<32x128xf32, #tpu.memory_space<vmem>>, vector<32x128xf32>
    %cst_63 = arith.constant dense<0.000000e+00> : vector<8x128xf32>
    %236 = tpu.matmul %234, %235, %cst_63 {dimension_numbers = #tpu.dot_dimension_numbers<[1], [0], [0], [1], [0, 0, 1, 1], [], []>} : vector<8x32xf32>, vector<32x128xf32>, vector<8x128xf32> -> vector<8x128xf32>
    %c0_64 = arith.constant 0 : index
    %c0_65 = arith.constant 0 : index
    %237 = vector.load %arg9[%c0_64, %c0_65] : memref<1x128xf32, #tpu.memory_space<vmem>>, vector<1x128xf32>
    %238 = vector.broadcast %237 : vector<1x128xf32> to vector<8x128xf32>
    %239 = arith.addf %236, %238 : vector<8x128xf32>
    %240 = arith.mulf %239, %239 : vector<8x128xf32>
    %cst_66 = arith.constant dense<0.000000e+00> : vector<8xf32>
    %241 = vector.multi_reduction <add>, %240, %cst_66 [1] : vector<8x128xf32> to vector<8xf32>
    %242 = vector.shape_cast %241 : vector<8xf32> to vector<8x1xf32>
    %cst_67 = arith.constant 1.000000e-24 : f32
    %243 = vector.broadcast %cst_67 : f32 to vector<8x1xf32>
    %244 = arith.maximumf %242, %243 : vector<8x1xf32>
    %245 = math.rsqrt %244 : vector<8x1xf32>
    %246 = vector.broadcast %245 : vector<8x1xf32> to vector<8x128xf32>
    %247 = arith.mulf %239, %246 : vector<8x128xf32>
    %c0_68 = arith.constant 0 : index
    %c0_69 = arith.constant 0 : index
    %248 = vector.load %arg10[%c0_68, %c0_69] : memref<8x128xf32, #tpu.memory_space<vmem>>, vector<8x128xf32>
    tpu.vector_store %arg10[%c0_68, %c0_69], %247 {strides = array<i32>} : memref<8x128xf32, #tpu.memory_space<vmem>>, vector<8x128xf32>,
    return
  }
}

</mosaic_0001>

<bundles_post_ra>
// kernel: tpu_custom_call.1
= control target key start
LH: loop header
LB: loop body
LE: loop exit
PB: predicated region body
PF: predicated region fallthrough
CT: control target
= control target key end

     0   :  { %vm50_vm0 = vcmask 130048   ;;  %s1198_s0 = inlined_call_operand.vmem [shape: f32[64,16], index: 0, kind: input, shape index: {}]   ;;  %s1199_s1 = inlined_call_operand.vmem [shape: f32[16,128], index: 1, kind: input, shape index: {}]   ;;  %s1200_s2 = inlined_call_operand.vmem [shape: f32[32,128], index: 2, kind: input, shape index: {}]   ;;  %s1201_s3 = inlined_call_operand.vmem [shape: f32[1,128], index: 3, kind: input, shape index: {}]   ;;  %s1202_s4 = inlined_call_operand.vmem [shape: f32[32,64], index: 4, kind: input, shape index: {}]   ;;  %s1203_s5 = inlined_call_operand.vmem [shape: f32[1,64], index: 5, kind: input, shape index: {}]   ;;  %s1204_s6 = inlined_call_operand.vmem [shape: f32[64,32], index: 6, kind: input, shape index: {}]   ;;  %s1205_s7 = inlined_call_operand.vmem [shape: f32[1,32], index: 7, kind: input, shape index: {}]   ;;  %s1206_s8 = inlined_call_operand.vmem [shape: f32[32,128], index: 8, kind: input, shape index: {}]   ;;  %s1207_s9 = inlined_call_operand.vmem [shape: f32[1,128], index: 9, kind: input, shape index: {}]   ;;  %s1208_s10 = inlined_call_operand.hbm [shape: f32[8,128], index: 10, kind: output, shape index: {}]  }
   0x1   :  { %v981_v0 = vld [vmem:[%s1200_s2 + $0x18] sm:$0xff]  ;;  %v45_v1 = vld [vmem:[%s1199_s1 + $0x8] sm:$0xff]  ;;  %v989_v2 = vld [vmem:[%s1200_s2 + $0x10] sm:$0xff] }
   0x2   :  { %142 = vmatpush.msra.mxu1 %v981_v0  ;;  %89 = vmatpush.msra.mxu0 %v45_v1  ;;  %v44_v3 = vld [vmem:[%s1199_s1] sm:$0xff]  ;;  %v1001_v5 = vld [vmem:[%s1200_s2 + $0x8] sm:$0xff] }
   0x3   :  { %v36_v4 = vld [vmem:[%s1198_s0] sm:$0xff]  ;;  %207 = vmatpush.msra.mxu2 %v981_v0  ;;  %827 = vmatpush.msra.mxu3 %v45_v1 }
   0x4   :  { %143 = vmatpush.msra.mxu1 %v989_v2  ;;  %90 = vmatpush.msra.mxu0 %v44_v3  ;;  %v1009_v6 = vld [vmem:[%s1200_s2] sm:$0xff] }
   0x5   :  { %791 = vmatmul.msk.f32.vlgmr.msra.gmra.mxu0 %vm50_vm0, %v36_v4  ;;  %208 = vmatpush.msra.mxu2 %v989_v2 }
   0x6   :  { %15 = vsyncpa [#allocation3], 0  ;;  %144 = vmatpush.msra.mxu1 %v1001_v5  ;;  %828 = vmatpush.msra.mxu3 %v44_v3  ;;  %v918_v7 = vmov 0.0   ;;  %v120_v8 = vlaneseq  ;;  %v1035_v10 = vld [vmem:[%s1201_s3] ss:$0 sm:$0xff]  ;;  %v919_v13 = vmov 1.0  }
   0x7   :  { %209 = vmatpush.msra.mxu2 %v1001_v5  ;;  %s920_s3 = smov 64   ;;  %s921_s27 = smov 32   ;;  %v37_v41 = vld [vmem:[%s1198_s0 + $0x8] sm:$0xff]  ;;  %vm126_vm8 = vcmask 261120  }
   0x8   :  { %272 = vmatpush.msrb.mxu3 %v981_v0  ;;  %145 = vmatpush.msra.mxu1 %v1009_v6  ;;  %v121_v9 = vand.u32 127, %v120_v8 }
   0x9   :  { %146 = vmatmul.f32.vlgmr.msra.gmra.mxu1 %v918_v7  ;;  %210 = vmatpush.msra.mxu2 %v1009_v6 }
   0xa   :  { %273 = vmatpush.msrb.mxu3 %v989_v2  ;;  %337 = vmatpush.msrb.mxu1 %v981_v0  ;;  %vm122_vm1 = vcmp.ge.s32.totalorder %v121_v9, 64  ;;  %vm123_vm2 = vcmp.lt.s32.totalorder %v121_v9, 96  ;;  %v42_v9 = vld [vmem:[%s1198_s0 + $0x30] sm:$0xff] }
   0xb   :  { %402 = vmatpush.msrb.mxu2 %v981_v0  ;;  %vm124_vm3 = vmand %vm122_vm1, %vm123_vm2  ;;  %797 = vmatmul.msk.f32.vlgmr.msra.gmra.mxu3 %vm50_vm0, %v42_v9 }
   0xc   :  { %274 = vmatpush.msrb.mxu3 %v1001_v5  ;;  %338 = vmatpush.msrb.mxu1 %v989_v2  ;;  %v1038_v14 = vsel %vm124_vm3, 2.0, %v919_v13 }
   0xd   :  { %403 = vmatpush.msrb.mxu2 %v989_v2  ;;  %792 = vmatmul.msk.f32.gmra.mxu0 %vm50_vm0, %v37_v41  ;;  %v39_v41 = vld [vmem:[%s1198_s0 + $0x18] sm:$0xff] }
   0xe   :  { %275 = vmatpush.msrb.mxu3 %v1009_v6  ;;  %339 = vmatpush.msrb.mxu1 %v1001_v5 }
   0xf   :  { %404 = vmatpush.msrb.mxu2 %v1001_v5 }
  0x10   :  { %340 = vmatpush.msrb.mxu1 %v1009_v6  ;;  %467 = vmatpush.msra.mxu3 %v981_v0 }
  0x11   :  { %405 = vmatpush.msrb.mxu2 %v1009_v6 }
  0x12   :  { %532 = vmatpush.msra.mxu1 %v981_v0  ;;  %468 = vmatpush.msra.mxu3 %v989_v2 }
  0x14   :  { %533 = vmatpush.msra.mxu1 %v989_v2  ;;  %469 = vmatpush.msra.mxu3 %v1001_v5 }
  0x16   :  { %534 = vmatpush.msra.mxu1 %v1001_v5  ;;  %470 = vmatpush.msra.mxu3 %v1009_v6 }
  0x18   :  { %535 = vmatpush.msra.mxu1 %v1009_v6 }
  0x82   :  { %v92_v11 = vpop.f32.mrf.mxu0 }
  0x83   :  { %v93_v12 = vadd.f32 %v1035_v10, %v92_v11  ;;  %v43_v11 = vld [vmem:[%s1198_s0 + $0x38] sm:$0xff] }
  0x84   :  { %798 = vmatmul.msk.f32.gmra.mxu3 %vm50_vm0, %v43_v11 }
  0x86   :  { %v147_v15 = vpop.f32.mrf.mxu1 }
  0x87   :  { %v150_v16 = vadd.f32 %v147_v15, %v93_v12 }
  0x89   :  { %v151_v17 = vmul.f32 %v150_v16, %v1038_v14 }
  0x8a   :  { %v95_v43 = vpop.f32.mrf.mxu0 }
  0x8b   :  { %v799_v18 = vmul.f32 -1.442695, %v151_v17  ;;  %v96_v44 = vadd.f32 %v1035_v10, %v95_v43 }
  0x8d   :  { %838 = vpow2.f32 %v799_v18 }
  0x8e   :  { %v1077_v15 = vpop.f32.mrf.mxu3 }
  0x93   :  { %v839_v19 = vpop.eup %838 }
  0x94   :  { %v155_v20 = vadd.f32 1.0, %v839_v19 }
  0x96   :  { %840 = vrcp.f32 %v155_v20  ;;  %v167_v24 = vand.u32 2147483648, %v155_v20  ;;  %v165_v26 = vand.u32 2147483647, %v155_v20  ;;  %vm161_vm5 = vweird.f32 %v155_v20 }
  0x98   :  { %v168_v28 = vor.u32 1.1754944e-38, %v167_v24  ;;  %vm166_vm7 = vcmp.eq.f32.partialorder %v165_v26, 8.507059e+37 }
  0x9c   :  { %v841_v21 = vpop.eup %840 }
  0x9d   :  { %v157_v22 = vmul.f32 %v841_v21, %v155_v20  ;;  %vm162_vm4 = vweird.f32 %v841_v21 }
  0x9e   :  { %vm163_vm6 = vmor %vm161_vm5, %vm162_vm4 }
  0x9f   :  { %v158_v23 = vsub.f32 1.0, %v157_v22 }
  0xa1   :  { %v159_v25 = vmul.f32 %v841_v21, %v158_v23 }
  0xa3   :  { %v160_v27 = vadd.f32 %v841_v21, %v159_v25 }
  0xa5   :  { %v164_v29 = vsel %vm163_vm6, %v841_v21, %v160_v27 }
  0xa6   :  { %v169_v30 = vsel %vm166_vm7, %v168_v28, %v164_v29 }
  0xa7   :  { %v171_v31 = vmul.f32 2.0, %v169_v30  ;;  %v173_v35 = vmul.f32 0.0, %v169_v30 }
  0xa9   :  { %v800_v32 = vadd.f32 -1.0, %v171_v31 }
  0xab   :  { %175 = vrot.lane.b32.xlu0 %v800_v32, %s920_s3 }
 0x11d   :  { %v176_v33 = vpop.permute.xlu0 %175 }
 0x11e   :  { %v178_v34 = vmul.f32 %v176_v33, %v169_v30 }
 0x120   :  { %180 = vrot.lane.b32.xlu0 %v178_v34, %s921_s27 }
 0x192   :  { %v181_v36 = vpop.permute.xlu0 %180 }
 0x193   :  { %v183_v37 = vadd.f32 %v181_v36, %v173_v35 }
 0x195   :  { %842 = vtanh.f32 %v183_v37 }
 0x19b   :  { %v843_v38 = vpop.eup %842 }
 0x19c   :  { %186 = vrot.lane.b32.xlu1 %v843_v38, %s920_s3 }
 0x20e   :  { %v187_v39 = vpop.permute.xlu1 %186 }
 0x20f   :  { %v189_v40 = vmul.f32 %v187_v39, %v169_v30 }
 0x211   :  { %191 = vrot.lane.b32.xlu1 %v189_v40, %s921_s27 }
 0x283   :  { %v192_v42 = vpop.permute.xlu1 %191 }
 0x284   :  { %801 = vmatmul.msk.f32.vlgmr.msra.gmra.mxu2 %vm126_vm8, %v192_v42 }
 0x285   :  { %597 = vmatpush.msra.mxu2 %v981_v0  ;;  %v38_v0 = vld [vmem:[%s1198_s0 + $0x10] sm:$0xff] }
 0x286   :  { %793 = vmatmul.msk.f32.gmra.mxu0 %vm50_vm0, %v38_v0  ;;  %v40_v0 = vld [vmem:[%s1198_s0 + $0x20] sm:$0xff] }
 0x287   :  { %598 = vmatpush.msra.mxu2 %v989_v2 }
 0x289   :  { %599 = vmatpush.msra.mxu2 %v1001_v5  ;;  %v1079_v5 = vpop.f32.mrf.mxu3 }
 0x28b   :  { %600 = vmatpush.msra.mxu2 %v1009_v6 }
 0x28e   :  { %794 = vmatmul.msk.f32.gmra.mxu0 %vm50_vm0, %v39_v41 }
 0x296   :  { %795 = vmatmul.msk.f32.gmra.mxu0 %vm50_vm0, %v40_v0 }
 0x303   :  { %v98_v6 = vpop.f32.mrf.mxu0 }
 0x304   :  { %v99_v16 = vadd.f32 %v1035_v10, %v98_v6 }
 0x307   :  { %v212_v45 = vpop.f32.mrf.mxu2 }
 0x308   :  { %v215_v46 = vadd.f32 %v212_v45, %v96_v44 }
 0x30a   :  { %v216_v47 = vmul.f32 %v215_v46, %v1038_v14 }
 0x30b   :  { %v101_v45 = vpop.f32.mrf.mxu0 }
 0x30c   :  { %v802_v48 = vmul.f32 -1.442695, %v216_v47  ;;  %v102_v46 = vadd.f32 %v1035_v10, %v101_v45 }
 0x30e   :  { %844 = vpow2.f32 %v802_v48 }
 0x313   :  { %v104_v6 = vpop.f32.mrf.mxu0 }
 0x314   :  { %v845_v49 = vpop.eup %844 }
 0x315   :  { %v220_v50 = vadd.f32 1.0, %v845_v49 }
 0x317   :  { %846 = vrcp.f32 %v220_v50  ;;  %v232_v54 = vand.u32 2147483648, %v220_v50  ;;  %v230_v56 = vand.u32 2147483647, %v220_v50  ;;  %vm226_vm10 = vweird.f32 %v220_v50 }
 0x319   :  { %v233_v58 = vor.u32 1.1754944e-38, %v232_v54  ;;  %vm231_vm12 = vcmp.eq.f32.partialorder %v230_v56, 8.507059e+37 }
 0x31d   :  { %v847_v51 = vpop.eup %846 }
 0x31e   :  { %v222_v52 = vmul.f32 %v847_v51, %v220_v50  ;;  %vm227_vm9 = vweird.f32 %v847_v51 }
 0x31f   :  { %vm228_vm11 = vmor %vm226_vm10, %vm227_vm9 }
 0x320   :  { %v223_v53 = vsub.f32 1.0, %v222_v52 }
 0x322   :  { %v224_v55 = vmul.f32 %v847_v51, %v223_v53 }
 0x324   :  { %v225_v57 = vadd.f32 %v847_v51, %v224_v55 }
 0x326   :  { %v229_v59 = vsel %vm228_vm11, %v847_v51, %v225_v57 }
 0x327   :  { %v234_v60 = vsel %vm231_vm12, %v233_v58, %v229_v59 }
 0x328   :  { %v236_v61 = vmul.f32 2.0, %v234_v60  ;;  %v238_v3 = vmul.f32 %v234_v60, %v183_v37 }
 0x32a   :  { %v803_v62 = vadd.f32 -1.0, %v236_v61 }
 0x32c   :  { %240 = vrot.lane.b32.xlu2 %v803_v62, %s920_s3 }
 0x386   :  { %v241_v63 = vpop.permute.xlu2 %240 }
 0x387   :  { %v243_v1 = vmul.f32 %v241_v63, %v234_v60 }
 0x389   :  { %245 = vrot.lane.b32.xlu2 %v243_v1, %s921_s27 }
 0x3e3   :  { %v246_v4 = vpop.permute.xlu2 %245 }
 0x3e4   :  { %v248_v7 = vadd.f32 %v246_v4, %v238_v3 }
 0x3e6   :  { %848 = vtanh.f32 %v248_v7 }
 0x3ec   :  { %v849_v8 = vpop.eup %848 }
 0x3ed   :  { %251 = vrot.lane.b32.xlu0 %v849_v8, %s920_s3 }
 0x45f   :  { %v252_v12 = vpop.permute.xlu0 %251 }
 0x460   :  { %v254_v13 = vmul.f32 %v252_v12, %v234_v60 }
 0x462   :  { %256 = vrot.lane.b32.xlu1 %v254_v13, %s921_s27 }
 0x4d4   :  { %v257_v2 = vpop.permute.xlu1 %256 }
 0x4d5   :  { %804 = vmatmul.msk.f32.vlgmr.msrb.gmra.mxu3 %vm126_vm8, %v257_v2 }
 0x558   :  { %v277_v17 = vpop.f32.mrf.mxu3 }
 0x559   :  { %v280_v18 = vadd.f32 %v277_v17, %v99_v16  ;;  %v105_v16 = vadd.f32 %v1035_v10, %v104_v6 }
 0x55b   :  { %v281_v19 = vmul.f32 %v280_v18, %v1038_v14 }
 0x55d   :  { %v805_v20 = vmul.f32 -1.442695, %v281_v19 }
 0x55f   :  { %850 = vpow2.f32 %v805_v20 }
 0x565   :  { %v851_v21 = vpop.eup %850 }
 0x566   :  { %v285_v22 = vadd.f32 1.0, %v851_v21 }
 0x568   :  { %852 = vrcp.f32 %v285_v22  ;;  %v297_v26 = vand.u32 2147483648, %v285_v22  ;;  %v295_v28 = vand.u32 2147483647, %v285_v22  ;;  %vm291_vm14 = vweird.f32 %v285_v22 }
 0x56a   :  { %v298_v30 = vor.u32 1.1754944e-38, %v297_v26  ;;  %vm296_vm1 = vcmp.eq.f32.partialorder %v295_v28, 8.507059e+37 }
 0x56e   :  { %v853_v23 = vpop.eup %852 }
 0x56f   :  { %v287_v24 = vmul.f32 %v853_v23, %v285_v22  ;;  %vm292_vm13 = vweird.f32 %v853_v23 }
 0x570   :  { %vm293_vm15 = vmor %vm291_vm14, %vm292_vm13 }
 0x571   :  { %v288_v25 = vsub.f32 1.0, %v287_v24 }
 0x573   :  { %v289_v27 = vmul.f32 %v853_v23, %v288_v25 }
 0x575   :  { %v290_v29 = vadd.f32 %v853_v23, %v289_v27 }
 0x577   :  { %v294_v31 = vsel %vm293_vm15, %v853_v23, %v290_v29 }
 0x578   :  { %v299_v32 = vsel %vm296_vm1, %v298_v30, %v294_v31 }
 0x579   :  { %v301_v33 = vmul.f32 2.0, %v299_v32  ;;  %v303_v37 = vmul.f32 %v299_v32, %v248_v7 }
 0x57b   :  { %v806_v34 = vadd.f32 -1.0, %v301_v33 }
 0x57d   :  { %305 = vrot.lane.b32.xlu2 %v806_v34, %s920_s3 }
 0x5d7   :  { %v306_v35 = vpop.permute.xlu2 %305 }
 0x5d8   :  { %v308_v36 = vmul.f32 %v306_v35, %v299_v32 }
 0x5da   :  { %310 = vrot.lane.b32.xlu0 %v308_v36, %s921_s27 }
 0x64c   :  { %v311_v38 = vpop.permute.xlu0 %310 }
 0x64d   :  { %v313_v39 = vadd.f32 %v311_v38, %v303_v37 }
 0x64f   :  { %854 = vtanh.f32 %v313_v39 }
 0x655   :  { %v855_v40 = vpop.eup %854 }
 0x656   :  { %316 = vrot.lane.b32.xlu1 %v855_v40, %s920_s3 }
 0x6c8   :  { %v317_v42 = vpop.permute.xlu1 %316 }
 0x6c9   :  { %v319_v43 = vmul.f32 %v317_v42, %v299_v32 }
 0x6cb   :  { %321 = vrot.lane.b32.xlu2 %v319_v43, %s921_s27  ;;  %v41_v43 = vld [vmem:[%s1198_s0 + $0x28] sm:$0xff] }
 0x6cc   :  { %796 = vmatmul.msk.f32.gmra.mxu0 %vm50_vm0, %v41_v43 }
 0x725   :  { %v322_v44 = vpop.permute.xlu2 %321 }
 0x726   :  { %807 = vmatmul.msk.f32.vlgmr.msrb.gmra.mxu1 %vm126_vm8, %v322_v44 }
 0x749   :  { %v107_v45 = vpop.f32.mrf.mxu0 }
 0x7a3   :  { %v342_v47 = vpop.f32.mrf.mxu1 }
 0x7a4   :  { %v345_v48 = vadd.f32 %v342_v47, %v102_v46  ;;  %v108_v46 = vadd.f32 %v1035_v10, %v107_v45 }
 0x7a6   :  { %v346_v49 = vmul.f32 %v345_v48, %v1038_v14 }
 0x7a8   :  { %v808_v50 = vmul.f32 -1.442695, %v346_v49 }
 0x7aa   :  { %856 = vpow2.f32 %v808_v50 }
 0x7b0   :  { %v857_v51 = vpop.eup %856 }
 0x7b1   :  { %v350_v52 = vadd.f32 1.0, %v857_v51 }
 0x7b3   :  { %858 = vrcp.f32 %v350_v52  ;;  %v362_v56 = vand.u32 2147483648, %v350_v52  ;;  %v360_v58 = vand.u32 2147483647, %v350_v52  ;;  %vm356_vm3 = vweird.f32 %v350_v52 }
 0x7b5   :  { %v363_v60 = vor.u32 1.1754944e-38, %v362_v56  ;;  %vm361_vm5 = vcmp.eq.f32.partialorder %v360_v58, 8.507059e+37 }
 0x7b9   :  { %v859_v53 = vpop.eup %858 }
 0x7ba   :  { %v352_v54 = vmul.f32 %v859_v53, %v350_v52  ;;  %vm357_vm2 = vweird.f32 %v859_v53 }
 0x7bb   :  { %vm358_vm4 = vmor %vm356_vm3, %vm357_vm2 }
 0x7bc   :  { %v353_v55 = vsub.f32 1.0, %v352_v54 }
 0x7be   :  { %v354_v57 = vmul.f32 %v859_v53, %v353_v55 }
 0x7c0   :  { %v355_v59 = vadd.f32 %v859_v53, %v354_v57 }
 0x7c2   :  { %v359_v61 = vsel %vm358_vm4, %v859_v53, %v355_v59 }
 0x7c3   :  { %v364_v62 = vsel %vm361_vm5, %v363_v60, %v359_v61 }
 0x7c4   :  { %v366_v63 = vmul.f32 2.0, %v364_v62  ;;  %v368_v7 = vmul.f32 %v364_v62, %v313_v39 }
 0x7c6   :  { %v809_v1 = vadd.f32 -1.0, %v366_v63 }
 0x7c8   :  { %370 = vrot.lane.b32.xlu0 %v809_v1, %s920_s3 }
 0x83a   :  { %v371_v3 = vpop.permute.xlu0 %370 }
 0x83b   :  { %v373_v4 = vmul.f32 %v371_v3, %v364_v62 }
 0x83d   :  { %375 = vrot.lane.b32.xlu1 %v373_v4, %s921_s27 }
 0x8af   :  { %v376_v8 = vpop.permute.xlu1 %375 }
 0x8b0   :  { %v378_v9 = vadd.f32 %v376_v8, %v368_v7 }
 0x8b2   :  { %860 = vtanh.f32 %v378_v9 }
 0x8b8   :  { %v861_v11 = vpop.eup %860 }
 0x8b9   :  { %381 = vrot.lane.b32.xlu2 %v861_v11, %s920_s3 }
 0x913   :  { %v382_v12 = vpop.permute.xlu2 %381 }
 0x914   :  { %v384_v13 = vmul.f32 %v382_v12, %v364_v62 }
 0x916   :  { %386 = vrot.lane.b32.xlu0 %v384_v13, %s921_s27 }
 0x988   :  { %v387_v2 = vpop.permute.xlu0 %386 }
 0x989   :  { %810 = vmatmul.msk.f32.vlgmr.msrb.gmra.mxu2 %vm126_vm8, %v387_v2  ;;  %v111_v2 = vadd.f32 %v1035_v10, %v1077_v15 }
 0xa0c   :  { %v407_v17 = vpop.f32.mrf.mxu2 }
 0xa0d   :  { %v410_v18 = vadd.f32 %v407_v17, %v105_v16 }
 0xa0f   :  { %v411_v19 = vmul.f32 %v410_v18, %v1038_v14 }
 0xa11   :  { %v811_v20 = vmul.f32 -1.442695, %v411_v19 }
 0xa13   :  { %862 = vpow2.f32 %v811_v20 }
 0xa19   :  { %v863_v21 = vpop.eup %862 }
 0xa1a   :  { %v415_v22 = vadd.f32 1.0, %v863_v21 }
 0xa1c   :  { %864 = vrcp.f32 %v415_v22  ;;  %v427_v26 = vand.u32 2147483648, %v415_v22  ;;  %v425_v28 = vand.u32 2147483647, %v415_v22  ;;  %vm421_vm7 = vweird.f32 %v415_v22 }
 0xa1e   :  { %v428_v30 = vor.u32 1.1754944e-38, %v427_v26  ;;  %vm426_vm10 = vcmp.eq.f32.partialorder %v425_v28, 8.507059e+37 }
 0xa22   :  { %v865_v23 = vpop.eup %864 }
 0xa23   :  { %v417_v24 = vmul.f32 %v865_v23, %v415_v22  ;;  %vm422_vm6 = vweird.f32 %v865_v23 }
 0xa24   :  { %vm423_vm9 = vmor %vm421_vm7, %vm422_vm6 }
 0xa25   :  { %v418_v25 = vsub.f32 1.0, %v417_v24 }
 0xa27   :  { %v419_v27 = vmul.f32 %v865_v23, %v418_v25 }
 0xa29   :  { %v420_v29 = vadd.f32 %v865_v23, %v419_v27 }
 0xa2b   :  { %v424_v31 = vsel %vm423_vm9, %v865_v23, %v420_v29  ;;  %vm697_vm9 = vcmask 523264  }
 0xa2c   :  { %v429_v32 = vsel %vm426_vm10, %v428_v30, %v424_v31 }
 0xa2d   :  { %v431_v33 = vmul.f32 2.0, %v429_v32  ;;  %v433_v37 = vmul.f32 %v429_v32, %v378_v9 }
 0xa2f   :  { %v812_v34 = vadd.f32 -1.0, %v431_v33 }
 0xa31   :  { %435 = vrot.lane.b32.xlu1 %v812_v34, %s920_s3 }
 0xaa3   :  { %v436_v35 = vpop.permute.xlu1 %435 }
 0xaa4   :  { %v438_v36 = vmul.f32 %v436_v35, %v429_v32 }
 0xaa6   :  { %440 = vrot.lane.b32.xlu2 %v438_v36, %s921_s27 }
 0xb00   :  { %v441_v38 = vpop.permute.xlu2 %440 }
 0xb01   :  { %v443_v39 = vadd.f32 %v441_v38, %v433_v37 }
 0xb03   :  { %866 = vtanh.f32 %v443_v39 }
 0xb09   :  { %v867_v40 = vpop.eup %866 }
 0xb0a   :  { %446 = vrot.lane.b32.xlu0 %v867_v40, %s920_s3 }
 0xb7c   :  { %v447_v41 = vpop.permute.xlu0 %446 }
 0xb7d   :  { %v449_v42 = vmul.f32 %v447_v41, %v429_v32  ;;  %v114_v41 = vadd.f32 %v1035_v10, %v1079_v5 }
 0xb7f   :  { %451 = vrot.lane.b32.xlu1 %v449_v42, %s921_s27 }
 0xbf1   :  { %v452_v44 = vpop.permute.xlu1 %451 }
 0xbf2   :  { %813 = vmatmul.msk.f32.vlgmr.msra.gmra.mxu3 %vm126_vm8, %v452_v44 }
 0xc75   :  { %v472_v47 = vpop.f32.mrf.mxu3 }
 0xc76   :  { %v475_v48 = vadd.f32 %v472_v47, %v108_v46 }
 0xc78   :  { %v476_v49 = vmul.f32 %v475_v48, %v1038_v14 }
 0xc7a   :  { %v814_v50 = vmul.f32 -1.442695, %v476_v49 }
 0xc7c   :  { %868 = vpow2.f32 %v814_v50 }
 0xc82   :  { %v869_v51 = vpop.eup %868 }
 0xc83   :  { %v480_v52 = vadd.f32 1.0, %v869_v51 }
 0xc85   :  { %870 = vrcp.f32 %v480_v52  ;;  %v492_v56 = vand.u32 2147483648, %v480_v52  ;;  %v490_v58 = vand.u32 2147483647, %v480_v52  ;;  %vm486_vm11 = vweird.f32 %v480_v52 }
 0xc87   :  { %v493_v60 = vor.u32 1.1754944e-38, %v492_v56  ;;  %vm491_vm13 = vcmp.eq.f32.partialorder %v490_v58, 8.507059e+37 }
 0xc8b   :  { %v871_v53 = vpop.eup %870 }
 0xc8c   :  { %v482_v54 = vmul.f32 %v871_v53, %v480_v52  ;;  %vm487_vm0 = vweird.f32 %v871_v53 }
 0xc8d   :  { %vm488_vm12 = vmor %vm486_vm11, %vm487_vm0 }
 0xc8e   :  { %v483_v55 = vsub.f32 1.0, %v482_v54 }
 0xc90   :  { %v484_v57 = vmul.f32 %v871_v53, %v483_v55 }
 0xc92   :  { %v485_v59 = vadd.f32 %v871_v53, %v484_v57 }
 0xc94   :  { %v489_v61 = vsel %vm488_vm12, %v871_v53, %v485_v59 }
 0xc95   :  { %v494_v62 = vsel %vm491_vm13, %v493_v60, %v489_v61 }
 0xc96   :  { %v496_v63 = vmul.f32 2.0, %v494_v62  ;;  %v498_v7 = vmul.f32 %v494_v62, %v443_v39 }
 0xc98   :  { %v815_v1 = vadd.f32 -1.0, %v496_v63  ;;  %v648_v63 = vld [vmem:[%s1202_s4 + $0x18] sm:$0xff] }
 0xc99   :  { %670 = vmatpush.msrb.mxu3 %v648_v63 }
 0xc9a   :  { %500 = vrot.lane.b32.xlu2 %v815_v1, %s920_s3  ;;  %v647_v1 = vld [vmem:[%s1202_s4 + $0x10] sm:$0xff] }
 0xc9b   :  { %671 = vmatpush.msrb.mxu3 %v647_v1 }
 0xcf4   :  { %v501_v3 = vpop.permute.xlu2 %500 }
 0xcf5   :  { %v503_v4 = vmul.f32 %v501_v3, %v494_v62  ;;  %v646_v3 = vld [vmem:[%s1202_s4 + $0x8] sm:$0xff] }
 0xcf6   :  { %672 = vmatpush.msrb.mxu3 %v646_v3 }
 0xcf7   :  { %505 = vrot.lane.b32.xlu0 %v503_v4, %s921_s27  ;;  %v645_v4 = vld [vmem:[%s1202_s4] sm:$0xff] }
 0xcf8   :  { %673 = vmatpush.msrb.mxu3 %v645_v4 }
 0xd69   :  { %v506_v8 = vpop.permute.xlu0 %505 }
 0xd6a   :  { %v508_v9 = vadd.f32 %v506_v8, %v498_v7 }
 0xd6c   :  { %872 = vtanh.f32 %v508_v9 }
 0xd72   :  { %v873_v11 = vpop.eup %872 }
 0xd73   :  { %511 = vrot.lane.b32.xlu1 %v873_v11, %s920_s3  ;;  %v692_v11 = vld [vmem:[%s1204_s6 + $0x38] sm:$0xff] }
 0xd74   :  { %709 = vmatpush.msrb.mxu1 %v692_v11 }
 0xde5   :  { %v512_v12 = vpop.permute.xlu1 %511 }
 0xde6   :  { %v514_v13 = vmul.f32 %v512_v12, %v494_v62  ;;  %v691_v12 = vld [vmem:[%s1204_s6 + $0x30] sm:$0xff] }
 0xde7   :  { %710 = vmatpush.msrb.mxu1 %v691_v12 }
 0xde8   :  { %516 = vrot.lane.b32.xlu2 %v514_v13, %s921_s27  ;;  %v690_v13 = vld [vmem:[%s1204_s6 + $0x28] sm:$0xff] }
 0xde9   :  { %711 = vmatpush.msrb.mxu1 %v690_v13 }
 0xe42   :  { %v517_v0 = vpop.permute.xlu2 %516 }
 0xe43   :  { %816 = vmatmul.msk.f32.vlgmr.msra.gmra.mxu1 %vm126_vm8, %v517_v0  ;;  %v689_v0 = vld [vmem:[%s1204_s6 + $0x20] sm:$0xff] }
 0xe44   :  { %712 = vmatpush.msrb.mxu1 %v689_v0 }
 0xec0   :  { %v537_v6 = vpop.f32.mrf.mxu1 }
 0xec1   :  { %v540_v16 = vadd.f32 %v537_v6, %v111_v2  ;;  %v688_v2 = vld [vmem:[%s1204_s6 + $0x18] sm:$0xff]  ;;  %v687_v6 = vld [vmem:[%s1204_s6 + $0x10] sm:$0xff] }
 0xec2   :  { %713 = vmatpush.msrb.mxu1 %v688_v2 }
 0xec3   :  { %v541_v17 = vmul.f32 %v540_v16, %v1038_v14  ;;  %v686_v16 = vld [vmem:[%s1204_s6 + $0x8] sm:$0xff] }
 0xec4   :  { %714 = vmatpush.msrb.mxu1 %v687_v6 }
 0xec5   :  { %v817_v18 = vmul.f32 -1.442695, %v541_v17  ;;  %v685_v17 = vld [vmem:[%s1204_s6] sm:$0xff] }
 0xec6   :  { %715 = vmatpush.msrb.mxu1 %v686_v16 }
 0xec7   :  { %874 = vpow2.f32 %v817_v18  ;;  %v835_v18 = vld [vmem:[%s1203_s5] ss:$0 sm:$0xff] }
 0xec8   :  { %716 = vmatpush.msrb.mxu1 %v685_v17 }
 0xecd   :  { %v875_v19 = vpop.eup %874 }
 0xece   :  { %v545_v20 = vadd.f32 1.0, %v875_v19 }
 0xed0   :  { %876 = vrcp.f32 %v545_v20  ;;  %v557_v24 = vand.u32 2147483648, %v545_v20  ;;  %v555_v26 = vand.u32 2147483647, %v545_v20  ;;  %vm551_vm15 = vweird.f32 %v545_v20 }
 0xed2   :  { %v558_v15 = vor.u32 1.1754944e-38, %v557_v24  ;;  %vm556_vm2 = vcmp.eq.f32.partialorder %v555_v26, 8.507059e+37 }
 0xed6   :  { %v877_v21 = vpop.eup %876 }
 0xed7   :  { %v547_v22 = vmul.f32 %v877_v21, %v545_v20  ;;  %vm552_vm14 = vweird.f32 %v877_v21 }
 0xed8   :  { %vm553_vm1 = vmor %vm551_vm15, %vm552_vm14 }
 0xed9   :  { %v548_v23 = vsub.f32 1.0, %v547_v22 }
 0xedb   :  { %v549_v25 = vmul.f32 %v877_v21, %v548_v23 }
 0xedd   :  { %v550_v27 = vadd.f32 %v877_v21, %v549_v25 }
 0xedf   :  { %v554_v28 = vsel %vm553_vm1, %v877_v21, %v550_v27  ;;  %v731_v27 = vld [vmem:[%s1206_s8 + $0x18] sm:$0xff] }
 0xee0   :  { %v559_v29 = vsel %vm556_vm2, %v558_v15, %v554_v28  ;;  %751 = vmatpush.msrb.mxu2 %v731_v27  ;;  %v730_v15 = vld [vmem:[%s1206_s8 + $0x10] sm:$0xff]  ;;  %v729_v28 = vld [vmem:[%s1206_s8 + $0x8] sm:$0xff] }
 0xee1   :  { %v561_v30 = vmul.f32 2.0, %v559_v29  ;;  %v563_v34 = vmul.f32 %v559_v29, %v508_v9 }
 0xee2   :  { %752 = vmatpush.msrb.mxu2 %v730_v15 }
 0xee3   :  { %v818_v31 = vadd.f32 -1.0, %v561_v30  ;;  %v836_v30 = vld [vmem:[%s1205_s7] ss:$0 sm:$0xff]  ;;  %s922_s7 = smov [#allocation2]  }
 0xee4   :  { %753 = vmatpush.msrb.mxu2 %v729_v28 }
 0xee5   :  { %565 = vrot.lane.b32.xlu0 %v818_v31, %s920_s3 }
 0xf57   :  { %v566_v32 = vpop.permute.xlu0 %565 }
 0xf58   :  { %v568_v33 = vmul.f32 %v566_v32, %v559_v29 }
 0xf5a   :  { %570 = vrot.lane.b32.xlu1 %v568_v33, %s921_s27 }
 0xfcc   :  { %v571_v35 = vpop.permute.xlu1 %570 }
 0xfcd   :  { %v573_v36 = vadd.f32 %v571_v35, %v563_v34 }
 0xfcf   :  { %878 = vtanh.f32 %v573_v36 }
 0xfd5   :  { %v879_v37 = vpop.eup %878 }
 0xfd6   :  { %576 = vrot.lane.b32.xlu2 %v879_v37, %s920_s3 }
0x1030   :  { %v577_v38 = vpop.permute.xlu2 %576 }
0x1031   :  { %v579_v39 = vmul.f32 %v577_v38, %v559_v29  ;;  %v728_v29 = vld [vmem:[%s1206_s8] sm:$0xff]  ;;  %s780_s8 = sshll.u32 %s922_s7, 4  ;;  %s781_s8 = int_to_ptr.vmem [resolvable:$true] %s780_s8 }
0x1032   :  { %754 = vmatpush.msrb.mxu2 %v728_v29 }
0x1033   :  { %581 = vrot.lane.b32.xlu0 %v579_v39, %s921_s27  ;;  %v837_v39 = vld [vmem:[%s1207_s9] ss:$0 sm:$0xff]  ;;  %s782_s9 = sshll.u32 %s1208_s10, 4  ;;  %s783_s9 = int_to_ptr.hbm [resolvable:$true] %s782_s9 }
0x10a5   :  { %v582_v40 = vpop.permute.xlu0 %581 }
0x10a6   :  { %819 = vmatmul.msk.f32.vlgmr.msra.gmra.mxu2 %vm126_vm8, %v582_v40 }
0x1129   :  { %v602_v42 = vpop.f32.mrf.mxu2 }
0x112a   :  { %v605_v43 = vadd.f32 %v602_v42, %v114_v41 }
0x112c   :  { %v606_v44 = vmul.f32 %v605_v43, %v1038_v14 }
0x112e   :  { %v820_v45 = vmul.f32 -1.442695, %v606_v44 }
0x1130   :  { %880 = vpow2.f32 %v820_v45 }
0x1136   :  { %v881_v46 = vpop.eup %880 }
0x1137   :  { %v610_v47 = vadd.f32 1.0, %v881_v46 }
0x1139   :  { %882 = vrcp.f32 %v610_v47  ;;  %v622_v51 = vand.u32 2147483648, %v610_v47  ;;  %v620_v53 = vand.u32 2147483647, %v610_v47  ;;  %vm616_vm4 = vweird.f32 %v610_v47 }
0x113b   :  { %v623_v10 = vor.u32 1.1754944e-38, %v622_v51  ;;  %vm621_vm6 = vcmp.eq.f32.partialorder %v620_v53, 8.507059e+37 }
0x113f   :  { %v883_v48 = vpop.eup %882 }
0x1140   :  { %v612_v49 = vmul.f32 %v883_v48, %v610_v47  ;;  %vm617_vm3 = vweird.f32 %v883_v48 }
0x1141   :  { %vm618_vm5 = vmor %vm616_vm4, %vm617_vm3 }
0x1142   :  { %v613_v50 = vsub.f32 1.0, %v612_v49 }
0x1144   :  { %v614_v52 = vmul.f32 %v883_v48, %v613_v50 }
0x1146   :  { %v615_v54 = vadd.f32 %v883_v48, %v614_v52 }
0x1148   :  { %v619_v5 = vsel %vm618_vm5, %v883_v48, %v615_v54 }
0x1149   :  { %v624_v55 = vsel %vm621_vm6, %v623_v10, %v619_v5 }
0x114a   :  { %v626_v14 = vmul.f32 2.0, %v624_v55  ;;  %v628_v59 = vmul.f32 %v624_v55, %v573_v36 }
0x114c   :  { %v821_v56 = vadd.f32 -1.0, %v626_v14 }
0x114e   :  { %630 = vrot.lane.b32.xlu1 %v821_v56, %s920_s3 }
0x11c0   :  { %v631_v57 = vpop.permute.xlu1 %630 }
0x11c1   :  { %v633_v58 = vmul.f32 %v631_v57, %v624_v55 }
0x11c3   :  { %635 = vrot.lane.b32.xlu2 %v633_v58, %s921_s27 }
0x121d   :  { %v636_v60 = vpop.permute.xlu2 %635 }
0x121e   :  { %v638_v61 = vadd.f32 %v636_v60, %v628_v59 }
0x1220   :  { %884 = vtanh.f32 %v638_v61 }
0x1226   :  { %v885_v62 = vpop.eup %884 }
0x1227   :  { %641 = vrot.lane.b32.xlu0 %v885_v62, %s920_s3 }
0x1299   :  { %v642_v7 = vpop.permute.xlu0 %641 }
0x129a   :  { %v644_v8 = vmul.f32 %v642_v7, %v624_v55 }
0x129c   :  { %654 = vrot.lane.b32.xlu1 %v644_v8, %s921_s27 }
0x130e   :  { %v655_v9 = vpop.permute.xlu1 %654 }
0x130f   :  { %822 = vmatmul.msk.f32.vlgmr.msrb.gmra.mxu3 %vm126_vm8, %v655_v9 }
0x1392   :  { %v675_v19 = vpop.f32.mrf.mxu3 }
0x1393   :  { %v676_v20 = vadd.f32 %v835_v18, %v675_v19 }
0x1395   :  { %v679_v21 = vmul.f32 1.442695, %v676_v20  ;;  %vm678_vm7 = vcmp.gt.f32.partialorder %v676_v20, 0.0 }
0x1397   :  { %886 = vpow2.f32 %v679_v21 }
0x139d   :  { %v887_v22 = vpop.eup %886 }
0x139e   :  { %v823_v23 = vadd.f32 -1.0, %v887_v22 }
0x13a0   :  { %v682_v24 = vmul.f32 1.6732632, %v823_v23 }
0x13a2   :  { %v683_v25 = vsel %vm678_vm7, %v676_v20, %v682_v24 }
0x13a3   :  { %v684_v26 = vmul.f32 1.050701, %v683_v25 }
0x13a5   :  { %824 = vmatmul.msk.f32.vlgmr.msrb.gmra.mxu1 %vm697_vm9, %v684_v26 }
0x1422   :  { %v718_v31 = vpop.f32.mrf.mxu1 }
0x1423   :  { %v719_v32 = vadd.f32 %v836_v30, %v718_v31 }
0x1425   :  { %v722_v33 = vmul.f32 1.442695, %v719_v32  ;;  %vm721_vm10 = vcmp.gt.f32.partialorder %v719_v32, 0.0 }
0x1427   :  { %888 = vpow2.f32 %v722_v33 }
0x142d   :  { %v889_v34 = vpop.eup %888 }
0x142e   :  { %v825_v35 = vadd.f32 -1.0, %v889_v34 }
0x1430   :  { %v725_v36 = vmul.f32 1.6732632, %v825_v35 }
0x1432   :  { %v726_v37 = vsel %vm721_vm10, %v719_v32, %v725_v36 }
0x1433   :  { %v727_v38 = vmul.f32 1.050701, %v726_v37 }
0x1435   :  { %826 = vmatmul.msk.f32.vlgmr.msrb.gmra.mxu2 %vm126_vm8, %v727_v38 }
0x14b8   :  { %v756_v40 = vpop.f32.mrf.mxu2 }
0x14b9   :  { %v757_v41 = vadd.f32 %v837_v39, %v756_v40 }
0x14bb   :  { %v759_v42 = vmul.f32 %v757_v41, %v757_v41 }
0x14bd   :  { %760 = vadd.xlane.f32.xlu2 %v759_v42 }
0x1530   :  { %v761_v43 = vpop.xlane.xlu2 %760 }
0x1531   :  { %v762_v44 = vmax.f32 %v761_v43, 1e-24 }
0x1533   :  { %890 = vrsqrt.f32 %v762_v44  ;;  %vm769_vm11 = vweird.f32 %v762_v44 }
0x1539   :  { %v891_v45 = vpop.eup %890 }
0x153a   :  { %v764_v46 = vmul.f32 %v891_v45, %v762_v44  ;;  %vm770_vm0 = vweird.f32 %v891_v45 }
0x153b   :  { %vm771_vm8 = vmor %vm769_vm11, %vm770_vm0 }
0x153c   :  { %v765_v47 = vmul.f32 %v891_v45, %v764_v46 }
0x153e   :  { %v766_v48 = vmul.f32 0.5, %v765_v47 }
0x1540   :  { %v767_v49 = vsub.f32 1.5, %v766_v48 }
0x1542   :  { %v768_v50 = vmul.f32 %v891_v45, %v767_v49 }
0x1544   :  { %v772_v51 = vsel %vm771_vm8, %v891_v45, %v768_v50 }
0x1545   :  { %v773_v52 = vmul.f32 %v772_v51, %v757_v41 }
0x1547   :  { %774 = vst [vmem:[#allocation2] sm:$0xff] %v773_v52 }
0x1548   :  { %785 = dma.vmem_to_hbm [thread:$0]  %s781_s8, 128, %s783_s9, [#allocation3]  }
0x1549   :  { %916 = dma.done.wait [#allocation3], 128  }
0x154a   :  { %917 = vsyncadd [#allocation3], 4294967168 }
0x154b   :  { %790 = vsyncpa [#allocation3], 1 }

</bundles_post_ra>
